<compile_context>
chip_gen: v7x
topology: tpu7x:2x2x1
jax: 0.10.0
libtpu: 0.0.40
codegen_flags: <defaults>
</compile_context>

<pallas_src>
import jax
import jax.numpy as jnp
import numpy as np
from jax.experimental import pallas as pl
from jax.experimental.pallas import tpu as pltpu

MID = 128      # mid_dim   (PyTorch default 1000; shrunk to a small demo size)
EMB = 32       # emb_dim
HID = 2 * MID  # FF hidden = mid_dim * 2
W_DIM = 10     # w_dim
N = 8          # number of patch embeddings fed to forward()
B = 2          # batch implied by w.shape[0]
EPS = 1e-5     # nn.LayerNorm default eps


def cnn_enc_kernel(x_ref, w_ref,
                   ln1w_ref, ln1b_ref, wgb1_ref, bgb1_ref,
                   ff_w1_ref, ff_b1_ref, ff_w2_ref, ff_b2_ref,
                   ln2w_ref, ln2b_ref, wgb2_ref, bgb2_ref,
                   o_ref):
    Bn = w_ref.shape[0]
    Nn = x_ref.shape[0]
    mid = x_ref.shape[1]
    emb = o_ref.shape[2]

    x = x_ref[...].astype(jnp.float32)      # (N, MID)   shared across batch
    w = w_ref[...].astype(jnp.float32)      # (B, W_DIM) all batch rows at once

    # ---- LayerNorm of x: batch-invariant, computed exactly once ----
    mu = jnp.mean(x, axis=-1, keepdims=True)
    var = jnp.mean(jnp.square(x - mu), axis=-1, keepdims=True)
    xn = (x - mu) * jax.lax.rsqrt(var + EPS)
    xn = xn * ln1w_ref[...] + ln1b_ref[...]                       # (N, MID)

    # ---- SLN norm1 gamma/beta: single fused (B, W_DIM) @ (W_DIM, 2*MID) ----
    gb1 = jnp.dot(w, wgb1_ref[...], preferred_element_type=jnp.float32) + bgb1_ref[...]
    g1 = gb1[:, :mid]                                             # (B, MID)
    b1 = gb1[:, mid:]                                             # (B, MID)

    # Broadcast over patches and flatten to (B*N, MID) for the FF matmuls.
    h = (g1[:, None, :] * xn[None, :, :] + b1[:, None, :]).reshape(Bn * Nn, mid)

    # ---- FF (lin[source_i]): Linear -> ReLU -> Linear ----
    # TODO(synk): FF's activation is not shown in the reference module; ReLU assumed.
    # Operands are cast to the dtype the FF weights were supplied in
    # (f32 by default; pass bf16 weights for the v6e/v7x fast-MXU path).
    u = jnp.dot(h.astype(ff_w1_ref.dtype), ff_w1_ref[...],
                preferred_element_type=jnp.float32) + ff_b1_ref[...]
    u = jnp.maximum(u, 0.0)
    y = jnp.dot(u.astype(ff_w2_ref.dtype), ff_w2_ref[...],
                preferred_element_type=jnp.float32) + ff_b2_ref[...]   # (B*N, EMB)

    # ---- SLN norm2 ----
    mu2 = jnp.mean(y, axis=-1, keepdims=True)
    var2 = jnp.mean(jnp.square(y - mu2), axis=-1, keepdims=True)
    yn = (y - mu2) * jax.lax.rsqrt(var2 + EPS)
    yn = yn * ln2w_ref[...] + ln2b_ref[...]                       # (B*N, EMB)

    gb2 = jnp.dot(w, wgb2_ref[...], preferred_element_type=jnp.float32) + bgb2_ref[...]
    g2 = gb2[:, :emb]                                             # (B, EMB)
    b2 = gb2[:, emb:]                                             # (B, EMB)

    out = g2[:, None, :] * yn.reshape(Bn, Nn, emb) + b2[:, None, :]
    # Single store of the full (B, N, EMB) slab.
    o_ref[...] = out.astype(o_ref.dtype)


def cnn_enc_forward(params, x, w, *, ff_dtype=jnp.float32):
    """Mirrors CNNEnc.forward with sln=True, source_i=0.

    x: [N, mid_dim] pre-compressed patch embeddings
    w: [B, w_dim]   -> x is expanded over the leading B dim (torch .expand)
    returns [B, N, emb_dim]

    ff_dtype: dtype of the FF matmul operands. Keep f32 for bit-tight parity;
    use jnp.bfloat16 on v6e/v7x at production sizes (mid_dim=1000, hid=2000)
    for the bf16 MXU path and half the weight VMEM footprint.
    """
    assert x.ndim == 2 and w.ndim == 2
    (ln1w, ln1b, wg1, bg1, wb1, bb1, ff_w1, ff_b1, ff_w2, ff_b2,
     ln2w, ln2b, wg2, bg2, wb2, bb2) = params
    Bn, _ = w.shape
    Nn, mid = x.shape
    emb = ff_w2.shape[1]

    # Fuse the four tiny w-projections into two matmul weights (done once in XLA).
    wgb1 = jnp.concatenate([wg1, wb1], axis=1)     # (W_DIM, 2*MID)
    bgb1 = jnp.concatenate([bg1, bb1], axis=1)     # (1, 2*MID)
    wgb2 = jnp.concatenate([wg2, wb2], axis=1)     # (W_DIM, 2*EMB)
    bgb2 = jnp.concatenate([bg2, bb2], axis=1)     # (1, 2*EMB)

    ff_w1c = ff_w1.astype(ff_dtype)
    ff_w2c = ff_w2.astype(ff_dtype)

    inputs = (x, w, ln1w, ln1b, wgb1, bgb1, ff_w1c, ff_b1, ff_w2c, ff_b2,
              ln2w, ln2b, wgb2, bgb2)

    # Single invocation (no grid): everything fits VMEM at these sizes, so there
    # is no pipeline overhead, no double-buffering, and every parameter is read
    # exactly once. At production sizes the FF matmuls would be tiled with a
    # grid over (B*N, HID) and Buffered(1) specs for the constant weights.
    vmem_spec = pl.BlockSpec(memory_space=pltpu.MemorySpace.VMEM)
    return pl.pallas_call(
        cnn_enc_kernel,
        out_shape=jax.ShapeDtypeStruct((Bn, Nn, emb), jnp.float32),
        in_specs=[vmem_spec] * len(inputs),
        out_specs=vmem_spec,
    )(*inputs)


def init_params(key):
    ks = jax.random.split(key, 8)
    s = 0.02
    ln1w = jnp.ones((1, MID), jnp.float32)
    ln1b = jnp.zeros((1, MID), jnp.float32)
    wg1 = s * jax.random.normal(ks[0], (W_DIM, MID), jnp.float32)
    bg1 = jnp.ones((1, MID), jnp.float32)          # gamma bias -> identity-ish scale
    wb1 = s * jax.random.normal(ks[1], (W_DIM, MID), jnp.float32)
    bb1 = jnp.zeros((1, MID), jnp.float32)
    ff_w1 = s * jax.random.normal(ks[2], (MID, HID), jnp.float32)
    ff_b1 = jnp.zeros((1, HID), jnp.float32)
    ff_w2 = s * jax.random.normal(ks[3], (HID, EMB), jnp.float32)
    ff_b2 = jnp.zeros((1, EMB), jnp.float32)
    ln2w = jnp.ones((1, EMB), jnp.float32)
    ln2b = jnp.zeros((1, EMB), jnp.float32)
    wg2 = s * jax.random.normal(ks[4], (W_DIM, EMB), jnp.float32)
    bg2 = jnp.ones((1, EMB), jnp.float32)
    wb2 = s * jax.random.normal(ks[5], (W_DIM, EMB), jnp.float32)
    bb2 = jnp.zeros((1, EMB), jnp.float32)
    return [ln1w, ln1b, wg1, bg1, wb1, bb1, ff_w1, ff_b1, ff_w2, ff_b2,
            ln2w, ln2b, wg2, bg2, wb2, bb2]


def reference(params, x, w):
    (ln1w, ln1b, wg1, bg1, wb1, bb1, w1, c1, w2, c2,
     ln2w, ln2b, wg2, bg2, wb2, bb2) = params
    xe = jnp.broadcast_to(x[None], (w.shape[0],) + x.shape)

    def ln(v, g, bi):
        mu = v.mean(-1, keepdims=True)
        var = ((v - mu) ** 2).mean(-1, keepdims=True)
        return (v - mu) / jnp.sqrt(var + EPS) * g + bi

    g1 = w @ wg1 + bg1
    b1 = w @ wb1 + bb1
    h = g1[:, None, :] * ln(xe, ln1w, ln1b) + b1[:, None, :]
    u = jnp.maximum(h @ w1 + c1, 0.0)
    y = u @ w2 + c2
    g2 = w @ wg2 + bg2
    b2 = w @ wb2 + bb2
    return g2[:, None, :] * ln(y, ln2w, ln2b) + b2[:, None, :]


if __name__ == "__main__":
    key = jax.random.PRNGKey(0)
    kx, kw, kp = jax.random.split(key, 3)
    x = jax.random.normal(kx, (N, MID), jnp.float32)     # patch embeddings [N, mid_dim]
    w = jax.random.normal(kw, (B, W_DIM), jnp.float32)   # style/source vector [B, w_dim]
    params = init_params(kp)

    out = cnn_enc_forward(params, x, w)                  # f32 FF path (bit-tight)
    out = jax.block_until_ready(out)

    ref = jax.block_until_ready(reference(params, x, w))
    np.testing.assert_allclose(np.asarray(out), np.asarray(ref), rtol=1e-4, atol=1e-4)

    print("KERNEL_OK")
</pallas_src>

<mosaic_0001>
module attributes {stable_mosaic.version = 11 : i64} {
  func.func @cnn_enc_kernel(%arg0: memref<8x128xf32, #tpu.memory_space<vmem>>, %arg1: memref<2x10xf32, #tpu.memory_space<vmem>>, %arg2: memref<1x128xf32, #tpu.memory_space<vmem>>, %arg3: memref<1x128xf32, #tpu.memory_space<vmem>>, %arg4: memref<10x256xf32, #tpu.memory_space<vmem>>, %arg5: memref<1x256xf32, #tpu.memory_space<vmem>>, %arg6: memref<128x256xf32, #tpu.memory_space<vmem>>, %arg7: memref<1x256xf32, #tpu.memory_space<vmem>>, %arg8: memref<256x32xf32, #tpu.memory_space<vmem>>, %arg9: memref<1x32xf32, #tpu.memory_space<vmem>>, %arg10: memref<1x32xf32, #tpu.memory_space<vmem>>, %arg11: memref<1x32xf32, #tpu.memory_space<vmem>>, %arg12: memref<10x64xf32, #tpu.memory_space<vmem>>, %arg13: memref<1x64xf32, #tpu.memory_space<vmem>>, %arg14: memref<2x8x32xf32, #tpu.memory_space<vmem>>) attributes {dimension_semantics = [], scalar_prefetch = 0 : i64, scratch_operands = 0 : i64, tpu.core_type = #tpu.core_type<tc>} {
    %c0 = arith.constant 0 : index
    %c0_0 = arith.constant 0 : index
    %0 = vector.load %arg0[%c0, %c0_0] : memref<8x128xf32, #tpu.memory_space<vmem>>, vector<8x128xf32>
    %c0_1 = arith.constant 0 : index
    %c0_2 = arith.constant 0 : index
    %1 = vector.load %arg1[%c0_1, %c0_2] : memref<2x10xf32, #tpu.memory_space<vmem>>, vector<2x10xf32>
    %cst = arith.constant dense<0.000000e+00> : vector<8xf32>
    %2 = vector.multi_reduction <add>, %0, %cst [1] : vector<8x128xf32> to vector<8xf32>
    %3 = vector.shape_cast %2 : vector<8xf32> to vector<8x1xf32>
    %cst_3 = arith.constant 1.280000e+02 : f32
    %4 = vector.broadcast %cst_3 : f32 to vector<8x1xf32>
    %5 = arith.divf %3, %4 : vector<8x1xf32>
    %6 = vector.broadcast %5 : vector<8x1xf32> to vector<8x128xf32>
    %7 = arith.subf %0, %6 : vector<8x128xf32>
    %8 = arith.mulf %7, %7 : vector<8x128xf32>
    %cst_4 = arith.constant dense<0.000000e+00> : vector<8xf32>
    %9 = vector.multi_reduction <add>, %8, %cst_4 [1] : vector<8x128xf32> to vector<8xf32>
    %10 = vector.shape_cast %9 : vector<8xf32> to vector<8x1xf32>
    %cst_5 = arith.constant 1.280000e+02 : f32
    %11 = vector.broadcast %cst_5 : f32 to vector<8x1xf32>
    %12 = arith.divf %10, %11 : vector<8x1xf32>
    %13 = vector.broadcast %5 : vector<8x1xf32> to vector<8x128xf32>
    %14 = arith.subf %0, %13 : vector<8x128xf32>
    %cst_6 = arith.constant 9.99999974E-6 : f32
    %15 = vector.broadcast %cst_6 : f32 to vector<8x1xf32>
    %16 = arith.addf %12, %15 : vector<8x1xf32>
    %17 = math.rsqrt %16 : vector<8x1xf32>
    %18 = vector.broadcast %17 : vector<8x1xf32> to vector<8x128xf32>
    %19 = arith.mulf %14, %18 : vector<8x128xf32>
    %c0_7 = arith.constant 0 : index
    %c0_8 = arith.constant 0 : index
    %20 = vector.load %arg2[%c0_7, %c0_8] : memref<1x128xf32, #tpu.memory_space<vmem>>, vector<1x128xf32>
    %21 = vector.broadcast %20 : vector<1x128xf32> to vector<8x128xf32>
    %22 = arith.mulf %19, %21 : vector<8x128xf32>
    %c0_9 = arith.constant 0 : index
    %c0_10 = arith.constant 0 : index
    %23 = vector.load %arg3[%c0_9, %c0_10] : memref<1x128xf32, #tpu.memory_space<vmem>>, vector<1x128xf32>
    %24 = vector.broadcast %23 : vector<1x128xf32> to vector<8x128xf32>
    %25 = arith.addf %22, %24 : vector<8x128xf32>
    %c0_11 = arith.constant 0 : index
    %c0_12 = arith.constant 0 : index
    %26 = vector.load %arg4[%c0_11, %c0_12] : memref<10x256xf32, #tpu.memory_space<vmem>>, vector<10x256xf32>
    %cst_13 = arith.constant dense<0.000000e+00> : vector<2x256xf32>
    %27 = tpu.matmul %1, %26, %cst_13 {dimension_numbers = #tpu.dot_dimension_numbers<[1], [0], [0], [1], [0, 0, 1, 1], [], []>} : vector<2x10xf32>, vector<10x256xf32>, vector<2x256xf32> -> vector<2x256xf32>
    %c0_14 = arith.constant 0 : index
    %c0_15 = arith.constant 0 : index
    %28 = vector.load %arg5[%c0_14, %c0_15] : memref<1x256xf32, #tpu.memory_space<vmem>>, vector<1x256xf32>
    %29 = vector.broadcast %28 : vector<1x256xf32> to vector<2x256xf32>
    %30 = arith.addf %27, %29 : vector<2x256xf32>
    %31 = vector.extract_strided_slice %30 {offsets = [0, 0], sizes = [2, 128], strides = [1, 1]} : vector<2x256xf32> to vector<2x128xf32>
    %32 = vector.extract_strided_slice %30 {offsets = [0, 128], sizes = [2, 128], strides = [1, 1]} : vector<2x256xf32> to vector<2x128xf32>
    %33 = vector.shape_cast %31 : vector<2x128xf32> to vector<2x1x128xf32>
    %34 = vector.shape_cast %25 : vector<8x128xf32> to vector<1x8x128xf32>
    %35 = vector.broadcast %33 : vector<2x1x128xf32> to vector<2x8x128xf32>
    %36 = vector.broadcast %34 : vector<1x8x128xf32> to vector<2x8x128xf32>
    %37 = arith.mulf %35, %36 : vector<2x8x128xf32>
    %38 = vector.shape_cast %32 : vector<2x128xf32> to vector<2x1x128xf32>
    %39 = vector.broadcast %38 : vector<2x1x128xf32> to vector<2x8x128xf32>
    %40 = arith.addf %37, %39 : vector<2x8x128xf32>
    %41 = vector.shape_cast %40 : vector<2x8x128xf32> to vector<16x128xf32>
    %c0_16 = arith.constant 0 : index
    %c0_17 = arith.constant 0 : index
    %42 = vector.load %arg6[%c0_16, %c0_17] : memref<128x256xf32, #tpu.memory_space<vmem>>, vector<128x256xf32>
    %cst_18 = arith.constant dense<0.000000e+00> : vector<16x256xf32>
    %43 = tpu.matmul %41, %42, %cst_18 {dimension_numbers = #tpu.dot_dimension_numbers<[1], [0], [0], [1], [0, 0, 1, 1], [], []>} : vector<16x128xf32>, vector<128x256xf32>, vector<16x256xf32> -> vector<16x256xf32>
    %c0_19 = arith.constant 0 : index
    %c0_20 = arith.constant 0 : index
    %44 = vector.load %arg7[%c0_19, %c0_20] : memref<1x256xf32, #tpu.memory_space<vmem>>, vector<1x256xf32>
    %45 = vector.broadcast %44 : vector<1x256xf32> to vector<16x256xf32>
    %46 = arith.addf %43, %45 : vector<16x256xf32>
    %cst_21 = arith.constant 0.000000e+00 : f32
    %47 = vector.broadcast %cst_21 : f32 to vector<16x256xf32>
    %48 = arith.maximumf %46, %47 : vector<16x256xf32>
    %c0_22 = arith.constant 0 : index
    %c0_23 = arith.constant 0 : index
    %49 = vector.load %arg8[%c0_22, %c0_23] : memref<256x32xf32, #tpu.memory_space<vmem>>, vector<256x32xf32>
    %cst_24 = arith.constant dense<0.000000e+00> : vector<16x32xf32>
    %50 = tpu.matmul %48, %49, %cst_24 {dimension_numbers = #tpu.dot_dimension_numbers<[1], [0], [0], [1], [0, 0, 1, 1], [], []>} : vector<16x256xf32>, vector<256x32xf32>, vector<16x32xf32> -> vector<16x32xf32>
    %c0_25 = arith.constant 0 : index
    %c0_26 = arith.constant 0 : index
    %51 = vector.load %arg9[%c0_25, %c0_26] : memref<1x32xf32, #tpu.memory_space<vmem>>, vector<1x32xf32>
    %52 = vector.broadcast %51 : vector<1x32xf32> to vector<16x32xf32>
    %53 = arith.addf %50, %52 : vector<16x32xf32>
    %cst_27 = arith.constant dense<0.000000e+00> : vector<16xf32>
    %54 = vector.multi_reduction <add>, %53, %cst_27 [1] : vector<16x32xf32> to vector<16xf32>
    %55 = vector.shape_cast %54 : vector<16xf32> to vector<16x1xf32>
    %cst_28 = arith.constant 3.200000e+01 : f32
    %56 = vector.broadcast %cst_28 : f32 to vector<16x1xf32>
    %57 = arith.divf %55, %56 : vector<16x1xf32>
    %58 = vector.broadcast %57 : vector<16x1xf32> to vector<16x32xf32>
    %59 = arith.subf %53, %58 : vector<16x32xf32>
    %60 = arith.mulf %59, %59 : vector<16x32xf32>
    %cst_29 = arith.constant dense<0.000000e+00> : vector<16xf32>
    %61 = vector.multi_reduction <add>, %60, %cst_29 [1] : vector<16x32xf32> to vector<16xf32>
    %62 = vector.shape_cast %61 : vector<16xf32> to vector<16x1xf32>
    %cst_30 = arith.constant 3.200000e+01 : f32
    %63 = vector.broadcast %cst_30 : f32 to vector<16x1xf32>
    %64 = arith.divf %62, %63 : vector<16x1xf32>
    %65 = vector.broadcast %57 : vector<16x1xf32> to vector<16x32xf32>
    %66 = arith.subf %53, %65 : vector<16x32xf32>
    %cst_31 = arith.constant 9.99999974E-6 : f32
    %67 = vector.broadcast %cst_31 : f32 to vector<16x1xf32>
    %68 = arith.addf %64, %67 : vector<16x1xf32>
    %69 = math.rsqrt %68 : vector<16x1xf32>
    %70 = vector.broadcast %69 : vector<16x1xf32> to vector<16x32xf32>
    %71 = arith.mulf %66, %70 : vector<16x32xf32>
    %c0_32 = arith.constant 0 : index
    %c0_33 = arith.constant 0 : index
    %72 = vector.load %arg10[%c0_32, %c0_33] : memref<1x32xf32, #tpu.memory_space<vmem>>, vector<1x32xf32>
    %73 = vector.broadcast %72 : vector<1x32xf32> to vector<16x32xf32>
    %74 = arith.mulf %71, %73 : vector<16x32xf32>
    %c0_34 = arith.constant 0 : index
    %c0_35 = arith.constant 0 : index
    %75 = vector.load %arg11[%c0_34, %c0_35] : memref<1x32xf32, #tpu.memory_space<vmem>>, vector<1x32xf32>
    %76 = vector.broadcast %75 : vector<1x32xf32> to vector<16x32xf32>
    %77 = arith.addf %74, %76 : vector<16x32xf32>
    %c0_36 = arith.constant 0 : index
    %c0_37 = arith.constant 0 : index
    %78 = vector.load %arg12[%c0_36, %c0_37] : memref<10x64xf32, #tpu.memory_space<vmem>>, vector<10x64xf32>
    %cst_38 = arith.constant dense<0.000000e+00> : vector<2x64xf32>
    %79 = tpu.matmul %1, %78, %cst_38 {dimension_numbers = #tpu.dot_dimension_numbers<[1], [0], [0], [1], [0, 0, 1, 1], [], []>} : vector<2x10xf32>, vector<10x64xf32>, vector<2x64xf32> -> vector<2x64xf32>
    %c0_39 = arith.constant 0 : index
    %c0_40 = arith.constant 0 : index
    %80 = vector.load %arg13[%c0_39, %c0_40] : memref<1x64xf32, #tpu.memory_space<vmem>>, vector<1x64xf32>
    %81 = vector.broadcast %80 : vector<1x64xf32> to vector<2x64xf32>
    %82 = arith.addf %79, %81 : vector<2x64xf32>
    %83 = vector.extract_strided_slice %82 {offsets = [0, 0], sizes = [2, 32], strides = [1, 1]} : vector<2x64xf32> to vector<2x32xf32>
    %84 = vector.extract_strided_slice %82 {offsets = [0, 32], sizes = [2, 32], strides = [1, 1]} : vector<2x64xf32> to vector<2x32xf32>
    %85 = vector.shape_cast %83 : vector<2x32xf32> to vector<2x1x32xf32>
    %86 = vector.shape_cast %77 : vector<16x32xf32> to vector<2x8x32xf32>
    %87 = vector.broadcast %85 : vector<2x1x32xf32> to vector<2x8x32xf32>
    %88 = arith.mulf %87, %86 : vector<2x8x32xf32>
    %89 = vector.shape_cast %84 : vector<2x32xf32> to vector<2x1x32xf32>
    %90 = vector.broadcast %89 : vector<2x1x32xf32> to vector<2x8x32xf32>
    %91 = arith.addf %88, %90 : vector<2x8x32xf32>
    %c0_41 = arith.constant 0 : index
    %c0_42 = arith.constant 0 : index
    %c0_43 = arith.constant 0 : index
    %92 = vector.load %arg14[%c0_41, %c0_42, %c0_43] : memref<2x8x32xf32, #tpu.memory_space<vmem>>, vector<2x8x32xf32>
    tpu.vector_store %arg14[%c0_41, %c0_42, %c0_43], %91 {strides = array<i32>} : memref<2x8x32xf32, #tpu.memory_space<vmem>>, vector<2x8x32xf32>,
    return
  }
}

</mosaic_0001>

<bundles_post_ra>
// kernel: tpu_custom_call.1
= control target key start
LH: loop header
LB: loop body
LE: loop exit
PB: predicated region body
PF: predicated region fallthrough
CT: control target
= control target key end

     0   :  { %vm98_vm0 = vcmask 1041408   ;;  %vm846_vm1 = vmmov 1   ;;  %v847_v8 = vmov 0.0   ;;  %s1239_s0 = inlined_call_operand.vmem [shape: f32[8,128], index: 0, kind: input, shape index: {}]   ;;  %s1240_s1 = inlined_call_operand.vmem [shape: f32[2,10], index: 1, kind: input, shape index: {}]   ;;  %s1241_s2 = inlined_call_operand.vmem [shape: f32[1,128], index: 2, kind: input, shape index: {}]   ;;  %s1242_s3 = inlined_call_operand.vmem [shape: f32[1,128], index: 3, kind: input, shape index: {}]   ;;  %s1243_s4 = inlined_call_operand.vmem [shape: f32[10,256], index: 4, kind: input, shape index: {}]   ;;  %s1244_s5 = inlined_call_operand.vmem [shape: f32[1,256], index: 5, kind: input, shape index: {}]   ;;  %s1245_s6 = inlined_call_operand.vmem [shape: f32[128,256], index: 6, kind: input, shape index: {}]   ;;  %s1246_s7 = inlined_call_operand.vmem [shape: f32[1,256], index: 7, kind: input, shape index: {}]   ;;  %s1247_s8 = inlined_call_operand.vmem [shape: f32[256,32], index: 8, kind: input, shape index: {}]   ;;  %s1248_s9 = inlined_call_operand.vmem [shape: f32[1,32], index: 9, kind: input, shape index: {}]   ;;  %s1249_s10 = inlined_call_operand.vmem [shape: f32[1,32], index: 10, kind: input, shape index: {}]   ;;  %s1250_s11 = inlined_call_operand.vmem [shape: f32[1,32], index: 11, kind: input, shape index: {}]   ;;  %s1251_s12 = inlined_call_operand.vmem [shape: f32[10,64], index: 12, kind: input, shape index: {}]   ;;  %s1252_s13 = inlined_call_operand.vmem [shape: f32[1,64], index: 13, kind: input, shape index: {}]   ;;  %s1253_s14 = inlined_call_operand.hbm [shape: f32[2,8,32], index: 14, kind: output, shape index: {}]  }
   0x1   :  { %v48_v0 = vld [vmem:[%s1239_s0] sm:$0xff]  ;;  %v79_v1 = vld [vmem:[%s1243_s4 + $0x8] sm:$0xff]  ;;  %v81_v2 = vld [vmem:[%s1243_s4 + $0x18] sm:$0x3]  ;;  %169 = vmatprep.mubr.f32.mxu0 %v847_v8  ;;  %354 = vmatprep.mubr.f32.mxu1 %v847_v8 }
   0x2   :  { %50 = vadd.xlane.f32.xlu0 %v48_v0  ;;  %v733_v3 = vpack.c.bf16 %v81_v2, %v79_v1  ;;  %vm939_vm2 = vmpackc.low %vm98_vm0, %vm846_vm1  ;;  %v78_v5 = vld [vmem:[%s1243_s4] sm:$0xff]  ;;  %v80_v6 = vld [vmem:[%s1243_s4 + $0x10] sm:$0x3] }
   0x3   :  { %v736_v7 = vpack.c.bf16 %v80_v6, %v78_v5 }
   0x4   :  { %19 = vsyncpa [#allocation3], 0  ;;  %735 = vmatprep.subr.msk.bf16.mxu0 %vm939_vm2, %v733_v3  ;;  %v958_v9 = vld [vmem:[%s1240_s1] sm:$0x3]  ;;  %vm94_vm3 = vcmask 80896   ;;  %v247_v10 = vld [vmem:[%s1245_s6 + $0x8] sm:$0xff] }
   0x5   :  { %738 = vmatpush1.bf16.msk.msra.mxu0 %vm939_vm2, %v736_v7  ;;  %v249_v11 = vld [vmem:[%s1245_s6 + $0x18] sm:$0xff]  ;;  %v246_v12 = vld [vmem:[%s1245_s6] sm:$0xff]  ;;  %v248_v14 = vld [vmem:[%s1245_s6 + $0x10] sm:$0xff]  ;;  %vm850_vm4 = vmmov 0   ;;  %vm485_vm5 = vcmask 261120   ;;  %s851_s4 = smov 96  }
   0x6   :  { %v739_v13 = vpack.c.bf16 %v249_v11, %v247_v10  ;;  %v251_v15 = vld [vmem:[%s1245_s6 + $0x28] sm:$0xff]  ;;  %v253_v16 = vld [vmem:[%s1245_s6 + $0x38] sm:$0xff]  ;;  %v741_v17 = vpack.c.bf16 %v248_v14, %v246_v12  ;;  %v250_v19 = vld [vmem:[%s1245_s6 + $0x20] sm:$0xff]  ;;  %s852_s26 = smov [#allocation2]  }
   0x7   :  { %v743_v18 = vpack.c.bf16 %v253_v16, %v251_v15  ;;  %v252_v20 = vld [vmem:[%s1245_s6 + $0x30] sm:$0xff]  ;;  %v255_v26 = vld [vmem:[%s1245_s6 + $0x48] sm:$0xff]  ;;  %v257_v27 = vld [vmem:[%s1245_s6 + $0x58] sm:$0xff] }
   0x8   :  { %678 = vmatmul.mubr.msk.f32.vlgmr.msra.gmra.mrb[0].mxu0 %vm94_vm3, %v958_v9  ;;  %740 = vmatprep.subr.bf16.mxu1 %v739_v13  ;;  %v745_v21 = vpack.c.bf16 %v252_v20, %v250_v19  ;;  %v747_v28 = vpack.c.bf16 %v257_v27, %v255_v26  ;;  %v254_v29 = vld [vmem:[%s1245_s6 + $0x40] sm:$0xff]  ;;  %v256_v30 = vld [vmem:[%s1245_s6 + $0x50] sm:$0xff]  ;;  %v259_v32 = vld [vmem:[%s1245_s6 + $0x68] sm:$0xff] }
   0x9   :  { %742 = vmatpush1.bf16.msra.mxu1 %v741_v17  ;;  %v749_v31 = vpack.c.bf16 %v256_v30, %v254_v29  ;;  %v261_v33 = vld [vmem:[%s1245_s6 + $0x78] sm:$0xff]  ;;  %v258_v35 = vld [vmem:[%s1245_s6 + $0x60] sm:$0xff]  ;;  %v260_v36 = vld [vmem:[%s1245_s6 + $0x70] sm:$0xff] }
   0xa   :  { %744 = vmatprep.subr.bf16.mxu1 %v743_v18  ;;  %v751_v34 = vpack.c.bf16 %v261_v33, %v259_v32  ;;  %v753_v37 = vpack.c.bf16 %v260_v36, %v258_v35  ;;  %v263_v38 = vld [vmem:[%s1245_s6 + $0x88] sm:$0xff]  ;;  %v265_v39 = vld [vmem:[%s1245_s6 + $0x98] sm:$0xff]  ;;  %v262_v41 = vld [vmem:[%s1245_s6 + $0x80] sm:$0xff] }
   0xb   :  { %v755_v40 = vpack.c.bf16 %v265_v39, %v263_v38  ;;  %v264_v42 = vld [vmem:[%s1245_s6 + $0x90] sm:$0xff]  ;;  %v267_v43 = vld [vmem:[%s1245_s6 + $0xa8] sm:$0xff]  ;;  %v269_v45 = vld [vmem:[%s1245_s6 + $0xb8] sm:$0xff] }
   0xc   :  { %v757_v44 = vpack.c.bf16 %v264_v42, %v262_v41  ;;  %v759_v46 = vpack.c.bf16 %v269_v45, %v267_v43  ;;  %v266_v47 = vld [vmem:[%s1245_s6 + $0xa0] sm:$0xff]  ;;  %v268_v48 = vld [vmem:[%s1245_s6 + $0xb0] sm:$0xff]  ;;  %v271_v49 = vld [vmem:[%s1245_s6 + $0xc8] sm:$0xff]  ;;  %v84_v43 = vlaneseq }
   0xd   :  { %746 = vmatpush1.bf16.msra.mxu1 %v745_v21  ;;  %v273_v50 = vld [vmem:[%s1245_s6 + $0xd8] sm:$0xff]  ;;  %v761_v51 = vpack.c.bf16 %v268_v48, %v266_v47  ;;  %v270_v53 = vld [vmem:[%s1245_s6 + $0xc0] sm:$0xff]  ;;  %v272_v54 = vld [vmem:[%s1245_s6 + $0xd0] sm:$0xff] }
   0xe   :  { %748 = vmatprep.subr.bf16.mxu1 %v747_v28  ;;  %v763_v52 = vpack.c.bf16 %v273_v50, %v271_v49  ;;  %v275_v55 = vld [vmem:[%s1245_s6 + $0xe8] sm:$0xff]  ;;  %v277_v56 = vld [vmem:[%s1245_s6 + $0xf8] sm:$0xff]  ;;  %v765_v57 = vpack.c.bf16 %v272_v54, %v270_v53  ;;  %v274_v59 = vld [vmem:[%s1245_s6 + $0xe0] sm:$0xff] }
   0xf   :  { %v767_v58 = vpack.c.bf16 %v277_v56, %v275_v55  ;;  %v276_v60 = vld [vmem:[%s1245_s6 + $0xf0] sm:$0xff]  ;;  %v387_v62 = vld [vmem:[%s1247_s8 + $0x80] sm:$0xff]  ;;  %v388_v63 = vld [vmem:[%s1247_s8 + $0x88] sm:$0xff] }
  0x10   :  { %v769_v61 = vpack.c.bf16 %v276_v60, %v274_v59  ;;  %v771_v1 = vpack.c.bf16 %v388_v63, %v387_v62  ;;  %v372_v2 = vld [vmem:[%s1247_s8 + $0x8] sm:$0xff]  ;;  %v389_v3 = vld [vmem:[%s1247_s8 + $0x90] sm:$0xff]  ;;  %v390_v5 = vld [vmem:[%s1247_s8 + $0x98] sm:$0xff] }
  0x11   :  { %750 = vmatpush1.bf16.msra.mxu1 %v749_v31  ;;  %v775_v7 = vpack.c.bf16 %v390_v5, %v389_v3  ;;  %v373_v10 = vld [vmem:[%s1247_s8 + $0x10] sm:$0xff]  ;;  %v374_v11 = vld [vmem:[%s1247_s8 + $0x18] sm:$0xff]  ;;  %v391_v12 = vld [vmem:[%s1247_s8 + $0xa0] sm:$0xff] }
  0x12   :  { %752 = vmatprep.subr.bf16.mxu1 %v751_v34  ;;  %772 = vmatprep.subr.bf16.mxu0 %v771_v1  ;;  %v392_v13 = vld [vmem:[%s1247_s8 + $0xa8] sm:$0xff]  ;;  %v777_v14 = vpack.c.bf16 %v374_v11, %v373_v10  ;;  %v375_v16 = vld [vmem:[%s1247_s8 + $0x20] sm:$0xff]  ;;  %v393_v18 = vld [vmem:[%s1247_s8 + $0xb0] sm:$0xff] }
  0x13   :  { %v779_v15 = vpack.c.bf16 %v392_v13, %v391_v12  ;;  %v376_v17 = vld [vmem:[%s1247_s8 + $0x28] sm:$0xff]  ;;  %v394_v19 = vld [vmem:[%s1247_s8 + $0xb8] sm:$0xff]  ;;  %v379_v29 = vld [vmem:[%s1247_s8 + $0x40] sm:$0xff] }
  0x14   :  { %v781_v20 = vpack.c.bf16 %v376_v17, %v375_v16  ;;  %v783_v21 = vpack.c.bf16 %v394_v19, %v393_v18  ;;  %v396_v26 = vld [vmem:[%s1247_s8 + $0xc8] sm:$0xff]  ;;  %v397_v31 = vld [vmem:[%s1247_s8 + $0xd0] sm:$0xff]  ;;  %v398_v32 = vld [vmem:[%s1247_s8 + $0xd8] sm:$0xff] }
  0x15   :  { %754 = vmatpush1.bf16.msra.mxu1 %v753_v37  ;;  %v380_v30 = vld [vmem:[%s1247_s8 + $0x48] sm:$0xff]  ;;  %v791_v34 = vpack.c.bf16 %v398_v32, %v397_v31  ;;  %v381_v35 = vld [vmem:[%s1247_s8 + $0x50] sm:$0xff]  ;;  %v382_v36 = vld [vmem:[%s1247_s8 + $0x58] sm:$0xff]  ;;  %v849_v31 = vmov 0.0|0.0  }
  0x16   :  { %756 = vmatprep.subr.bf16.mxu1 %v755_v40  ;;  %v789_v33 = vpack.c.bf16 %v380_v30, %v379_v29  ;;  %v399_v37 = vld [vmem:[%s1247_s8 + $0xe0] sm:$0xff]  ;;  %v400_v38 = vld [vmem:[%s1247_s8 + $0xe8] sm:$0xff]  ;;  %v793_v39 = vpack.c.bf16 %v382_v36, %v381_v35 }
  0x17   :  { %v795_v40 = vpack.c.bf16 %v400_v38, %v399_v37  ;;  %v82_v48 = vld [vmem:[%s1244_s5] sm:$0x3]  ;;  %v532_v30 = vld [vmem:[%s1251_s12 + $0x8] sm:$0x3] }
  0x18   :  { %v383_v19 = vld [vmem:[%s1247_s8 + $0x60] sm:$0xff] }
  0x19   :  { %758 = vmatpush1.bf16.msra.mxu1 %v757_v44  ;;  %v1140_v44 = vshrl.u32 %v84_v43, 7  ;;  %v531_v29 = vld [vmem:[%s1251_s12] sm:$0xff] }
  0x1a   :  { %760 = vmatprep.subr.bf16.mxu1 %v759_v46  ;;  %v848_v46 = vmov 1966171168   ;;  %v804_v32 = vpack.c.bf16 %v532_v30, %v531_v29 }
  0x1b   :  { %v1143_v45 = vsub.s32 0, %v1140_v44  ;;  %v178_v47 = vunpack.c.l.s4 %v848_v46  ;;  %v90_v49 = vsub.s32 1, %v1140_v44 }
  0x1d   :  { %762 = vmatpush1.bf16.msra.mxu1 %v761_v51  ;;  %v87_v50 = vrot.slane %v82_v48, %v1143_v45  ;;  %v179_v51 = vunpack.c.0.s8 %v178_v47  ;;  %v91_v53 = vrot.slane %v82_v48, %v90_v49  ;;  %v679_v48 = vld [vmem:[%s1248_s9] ss:$0 sm:$0xff] }
  0x1e   :  { %764 = vmatprep.subr.bf16.mxu1 %v763_v52 }
  0x1f   :  { %v1151_v56 = vsub.s32 %v179_v51, %v1140_v44 }
  0x21   :  { %766 = vmatpush1.bf16.msra.mxu1 %v765_v57 }
  0x22   :  { %768 = vmatprep.subr.bf16.mxu1 %v767_v58 }
  0x25   :  { %770 = vmatpush1.bf16.msra.mxu1 %v769_v61 }
  0x26   :  { %803 = vmatprep.subr.bf16.mxu1 %v849_v31 }
  0x8f   :  { %v51_v22 = vpop.xlane.xlu0 %50 }
  0x90   :  { %v53_v23 = vmul.f32 0.0078125, %v51_v22  ;;  %v377_v22 = vld [vmem:[%s1247_s8 + $0x30] sm:$0xff] }
  0x92   :  { %v986_v24 = vsub.f32 %v48_v0, %v53_v23  ;;  %v371_v0 = vld [vmem:[%s1247_s8] sm:$0xff]  ;;  %v378_v23 = vld [vmem:[%s1247_s8 + $0x38] sm:$0xff] }
  0x93   :  { %v773_v6 = vpack.c.bf16 %v372_v2, %v371_v0  ;;  %v785_v27 = vpack.c.bf16 %v378_v23, %v377_v22  ;;  %v674_v2 = vld [vmem:[%s1241_s2] ss:$0 sm:$0xff]  ;;  %v401_v22 = vld [vmem:[%s1247_s8 + $0xf0] sm:$0xff]  ;;  %v402_v23 = vld [vmem:[%s1247_s8 + $0xf8] sm:$0xff]  ;;  %s663_s2 = sshll.u32 %s852_s26, 4  ;;  %s664_s2 = int_to_ptr.vmem [resolvable:$true] %s663_s2 }
  0x94   :  { %v55_v25 = vmul.f32 %v986_v24, %v986_v24  ;;  %p827_p1 = scmp.lt.s32.totalorder %s664_s2, %s664_s2 }
  0x95   :  { %774 = vmatpush3.bf16.msra.mxu0 %v773_v6  ;;  %v675_v6 = vld [vmem:[%s1242_s3] ss:$0 sm:$0xff] }
  0x96   :  { %56 = vadd.xlane.f32.xlu0 %v55_v25  ;;  %776 = vmatprep.subr.bf16.mxu0 %v775_v7  ;;  %v395_v25 = vld [vmem:[%s1247_s8 + $0xc0] sm:$0xff] }
  0x97   :  { %v787_v28 = vpack.c.bf16 %v396_v26, %v395_v25  ;;  %v799_v25 = vpack.c.bf16 %v402_v23, %v401_v22  ;;  %v385_v26 = vld [vmem:[%s1247_s8 + $0x70] sm:$0xff] }
  0x99   :  { %778 = vmatpush3.bf16.msra.mxu0 %v777_v14 }
  0x9a   :  { %780 = vmatprep.subr.bf16.mxu0 %v779_v15 }
  0x9d   :  { %782 = vmatpush3.bf16.msra.mxu0 %v781_v20  ;;  %v384_v20 = vld [vmem:[%s1247_s8 + $0x68] sm:$0xff] }
  0x9e   :  { %784 = vmatprep.subr.bf16.mxu0 %v783_v21  ;;  %v797_v21 = vpack.c.bf16 %v384_v20, %v383_v19 }
  0xa1   :  { %786 = vmatpush3.bf16.msra.mxu0 %v785_v27  ;;  %v386_v27 = vld [vmem:[%s1247_s8 + $0x78] sm:$0xff] }
  0xa2   :  { %788 = vmatprep.subr.bf16.mxu0 %v787_v28  ;;  %v801_v28 = vpack.c.bf16 %v386_v27, %v385_v26 }
  0xa5   :  { %790 = vmatpush3.bf16.msra.mxu0 %v789_v33  ;;  %v278_v33 = vld [vmem:[%s1246_s7] sm:$0x3] }
  0xa6   :  { %792 = vmatprep.subr.bf16.mxu0 %v791_v34  ;;  %v283_v34 = vrot.slane %v278_v33, %v1143_v45  ;;  %v287_v35 = vrot.slane %v278_v33, %v90_v49 }
  0xa9   :  { %794 = vmatpush3.bf16.msra.mxu0 %v793_v39 }
  0xaa   :  { %796 = vmatprep.subr.bf16.mxu0 %v795_v40 }
  0xad   :  { %798 = vmatpush3.bf16.msra.mxu0 %v797_v21 }
  0xae   :  { %800 = vmatprep.subr.bf16.mxu0 %v799_v25 }
  0xb1   :  { %802 = vmatpush3.bf16.msra.mxu0 %v801_v28 }
  0xdb   :  { %v171_v41 = vpop.f32.mrb[0].mxu0 }
  0xdc   :  { %v173_v42 = vpop.f32.mrb[1].mxu0  ;;  %v172_v55 = vadd.f32 %v171_v41, %v87_v50 }
  0xdd   :  { %v174_v58 = vadd.f32 %v173_v42, %v91_v53 }
  0xde   :  { %v183_v59 = vrot.slane %v172_v55, %v1151_v56 }
  0xdf   :  { %v218_v60 = vrot.slane %v174_v58, %v1151_v56 }
  0xe0   :  { %v184_v61 = vcombine.high %v183_v59, %v183_v59  ;;  %v191_v63 = vrot.slane %v183_v59, %v1151_v56 }
  0xe1   :  { %v219_v62 = vcombine.high %v218_v60, %v218_v60  ;;  %v226_v10 = vrot.slane %v218_v60, %v1151_v56 }
  0xe2   :  { %v198_v0 = vrot.slane %v184_v61, %v1151_v56  ;;  %v202_v7 = vrot.slane %v191_v63, %v1143_v45 }
  0xe3   :  { %v233_v3 = vrot.slane %v219_v62, %v1151_v56  ;;  %v237_v16 = vrot.slane %v226_v10, %v1143_v45 }
  0xe4   :  { %v206_v12 = vrot.slane %v198_v0, %v1143_v45 }
  0xe5   :  { %v241_v14 = vrot.slane %v233_v3, %v1143_v45 }
 0x123   :  { %v57_v52 = vpop.xlane.xlu0 %56 }
 0x124   :  { %v58_v54 = vmul.f32 0.0078125, %v57_v52 }
 0x126   :  { %v59_v57 = vadd.f32 1e-05, %v58_v54 }
 0x128   :  { %816 = vrsqrt.f32 %v59_v57 }
 0x132   :  { %v817_v1 = vpop.eup %816 }
 0x133   :  { %v61_v5 = vmul.f32 %v817_v1, %v986_v24 }
 0x135   :  { %v69_v11 = vmul.f32 %v674_v2, %v61_v5  ;;  %v682_v5 = vld [vmem:[%s1252_s13] ss:$0 sm:$0xff] }
 0x137   :  { %v77_v13 = vadd.f32 %v675_v6, %v69_v11 }
 0x139   :  { %v209_v15 = vmul.f32 %v202_v7, %v77_v13  ;;  %v210_v17 = vmul.f32 %v206_v12, %v77_v13 }
 0x13b   :  { %v244_v18 = vadd.f32 %v237_v16, %v209_v15  ;;  %v245_v24 = vadd.f32 %v241_v14, %v210_v17 }
 0x13d   :  { %355 = vmatmul.mubr.f32.vlgmr.msra.gmra.mrb[0].mxu1 %v244_v18 }
 0x13e   :  { %360 = vmatprep.mubr.f32.mxu1 %v847_v8  ;;  %806 = vmatpush3.bf16.msk.msra.mxu1 %vm939_vm2, %v804_v32 }
 0x141   :  { %361 = vmatmul.mubr.f32.gmra.mrb[2].mxu1 %v245_v24 }
 0x142   :  { %730 = vmatprep.mubr.msk.f32.mxu1 %vm850_vm4, %v847_v8 }
 0x145   :  { %731 = vmatmul.mubr.msk.f32.vlgmr.msra.gmra.mrb[4].mxu1 %vm94_vm3, %v958_v9 }
 0x210   :  { %v356_v36 = vpop.f32.mrb[0].mxu1 }
 0x211   :  { %v357_v37 = vadd.f32 %v356_v36, %v283_v34  ;;  %v358_v38 = vpop.f32.mrb[1].mxu1 }
 0x212   :  { %v359_v39 = vadd.f32 %v358_v38, %v287_v35 }
 0x213   :  { %v367_v8 = vmax.f32 %v357_v37, 0.0 }
 0x214   :  { %v368_v40 = vmax.f32 %v359_v39, 0.0  ;;  %v362_v41 = vpop.f32.mrb[2].mxu1 }
 0x215   :  { %v363_v42 = vadd.f32 %v362_v41, %v283_v34  ;;  %v364_v4 = vpop.f32.mrb[3].mxu1 }
 0x216   :  { %v365_v43 = vadd.f32 %v364_v4, %v287_v35  ;;  %474 = vmatprep.mubr.f32.mxu0 %v368_v40 }
 0x217   :  { %475 = vmatmul.mubr.f32.vlgmr.msra.gmra.mrb[2].mxu0 %v367_v8  ;;  %v369_v44 = vmax.f32 %v363_v42, 0.0 }
 0x218   :  { %v370_v9 = vmax.f32 %v365_v43, 0.0  ;;  %v609_v58 = vpop.f32.mrb[4].mxu1 }
 0x219   :  { %v732_v59 = vpop.f32.mrb[5].mxu1  ;;  %v610_v10 = vadd.f32 %v682_v5, %v609_v58 }
 0x21a   :  { %479 = vmatprep.mubr.f32.mxu0 %v370_v9 }
 0x21b   :  { %480 = vmatmul.mubr.f32.gmra.mrb[4].mxu0 %v369_v44  ;;  %v620_v11 = vrot.slane %v610_v10, %v1151_v56 }
 0x21d   :  { %v621_v12 = vcombine.high %v620_v11, %v620_v11  ;;  %v628_v14 = vrot.slane %v620_v11, %v1151_v56 }
 0x21f   :  { %v635_v13 = vrot.slane %v621_v12, %v1151_v56  ;;  %v639_v16 = vrot.slane %v628_v14, %v1143_v45  ;;  %v680_v56 = vld [vmem:[%s1249_s10] ss:$0 sm:$0xff]  ;;  %s822_s10 = scalar_lea.vmem %s664_s2, 256 }
 0x220   :  { %p823_p0 = scmp.ne.s32.totalorder %s664_s2, %s822_s10  ;;  %p828_p2 = scmp.lt.s32.totalorder %s822_s10, %s822_s10 }
 0x221   :  { %v643_v15 = vrot.slane %v635_v13, %v1143_v45  ;;  %v681_v45 = vld [vmem:[%s1250_s11] ss:$0 sm:$0xff] }
 0x222   :  { %p829_p3 = por %p828_p2, %p827_p1 }
 0x224   :  { %p830_p4 = pnand %p829_p3, %p823_p0 }
 0x2ea   :  { %v717_v46 = vpop.f32.mrb[2].mxu0 }
 0x2eb   :  { %v718_v47 = vpop.f32.mrb[3].mxu0 }
 0x2ec   :  { %v719_v49 = vadd.f32 %v718_v47, %v717_v46 }
 0x2ee   :  { %v720_v50 = vpop.f32.mrb[4].mxu0  ;;  %v477_v51 = vadd.f32 %v719_v49, %v679_v48 }
 0x2ef   :  { %v721_v52 = vpop.f32.mrb[5].mxu0 }
 0x2f0   :  { %v722_v53 = vadd.f32 %v721_v52, %v720_v50  ;;  %v486_v54 = vsel %vm485_vm5, %v477_v51, 0.0 }
 0x2f1   :  { %487 = vadd.xlane.f32.xlu1 %v486_v54 }
 0x2f2   :  { %v482_v55 = vadd.f32 %v722_v53, %v679_v48 }
 0x2f4   :  { %v489_v57 = vsel %vm485_vm5, %v482_v55, 0.0 }
 0x2f5   :  { %490 = vadd.xlane.f32.xlu1 %v489_v57 }
 0x37e   :  { %v488_v60 = vpop.xlane.xlu1 %487 }
 0x37f   :  { %v493_v61 = vmul.f32 0.03125, %v488_v60 }
 0x381   :  { %v495_v62 = vsub.f32 %v477_v51, %v493_v61 }
 0x382   :  { %v491_v63 = vpop.xlane.xlu1 %490 }
 0x383   :  { %v494_v0 = vmul.f32 0.03125, %v491_v63  ;;  %v497_v1 = vmul.f32 %v495_v62, %v495_v62 }
 0x385   :  { %v496_v2 = vsub.f32 %v482_v55, %v494_v0  ;;  %v499_v3 = vsel %vm485_vm5, %v497_v1, 0.0 }
 0x386   :  { %500 = vadd.xlane.f32.xlu0 %v499_v3 }
 0x387   :  { %v498_v6 = vmul.f32 %v496_v2, %v496_v2 }
 0x389   :  { %v502_v7 = vsel %vm485_vm5, %v498_v6, 0.0 }
 0x38a   :  { %503 = vadd.xlane.f32.xlu1 %v502_v7 }
 0x39b   :  { %650 = vrot.lane.b32.xlu1 %v643_v15, %s851_s4 }
 0x39c   :  { %648 = vrot.lane.b32.xlu0 %v639_v16, %s851_s4 }
 0x413   :  { %v501_v17 = vpop.xlane.xlu0 %500 }
 0x414   :  { %v505_v18 = vmul.f32 0.03125, %v501_v17 }
 0x416   :  { %v507_v24 = vadd.f32 1e-05, %v505_v18 }
 0x417   :  { %v504_v19 = vpop.xlane.xlu1 %503  ;;  %v649_v29 = vpop.permute.xlu0 %648 }
 0x418   :  { %818 = vrsqrt.f32 %v507_v24  ;;  %v506_v20 = vmul.f32 0.03125, %v504_v19 }
 0x41a   :  { %v508_v21 = vadd.f32 1e-05, %v506_v20 }
 0x41b   :  { %v651_v34 = vpop.permute.xlu1 %650 }
 0x41c   :  { %820 = vrsqrt.f32 %v508_v21 }
 0x422   :  { %v819_v22 = vpop.eup %818 }
 0x423   :  { %v511_v23 = vmul.f32 %v819_v22, %v495_v62 }
 0x425   :  { %v520_v25 = vmul.f32 %v680_v56, %v511_v23 }
 0x426   :  { %v821_v26 = vpop.eup %820 }
 0x427   :  { %v529_v27 = vadd.f32 %v681_v45, %v520_v25  ;;  %v512_v28 = vmul.f32 %v821_v26, %v496_v2 }
 0x429   :  { %v646_v30 = vmul.f32 %v639_v16, %v529_v27  ;;  %v521_v31 = vmul.f32 %v680_v56, %v512_v28 }
 0x42b   :  { %v654_v32 = vadd.f32 %v649_v29, %v646_v30  ;;  %v530_v33 = vadd.f32 %v681_v45, %v521_v31 }
 0x42d   :  { %656 = vst.msk [vmem:[#allocation2] sm:$0xff] %vm485_vm5, %v654_v32  ;;  %v647_v35 = vmul.f32 %v643_v15, %v530_v33 }
 0x42f   :  { %v655_v36 = vadd.f32 %v651_v34, %v647_v35 }
 0x431   :  { %657 = vst.msk [vmem:[#allocation2 + $0x8] sm:$0xff] %vm485_vm5, %v655_v36 }
 0x432   :  { %833 = shalt.err (!%p830_p4)
}
 0x433   :  { %s834_s27 = scalar_lea.hbm %s1253_s14, 256 }
 0x434   :  { %p835_p5 = scmp.ne.s32.totalorder %s1253_s14, %s834_s27  ;;  %p838_p6 = scmp.lt.u32.totalorder %s834_s27, %s1253_s14 }
 0x436   :  { %p840_p7 = pnand %p838_p6, %p835_p5 }
 0x438   :  { %843 = shalt.err (!%p840_p7)
}
 0x439   :  { %s853_s15 = smov 128   ;;  %s854_s16 = smov 8  }
 0x43a   :  { %669 = dma.vmem_to_hbm [thread:$0]  %s664_s2, 256, %s1253_s14, [#allocation3], %s853_s15, %s853_s15, %s854_s16  }
 0x43b   :  { %844 = dma.done.wait [#allocation3], 256  }
 0x43c   :  { %845 = vsyncadd [#allocation3], 4294967040 }
 0x43d   :  { %673 = vsyncpa [#allocation3], 1 }

</bundles_post_ra>
